<compile_context>
chip_gen: v7x
topology: tpu7x:2x2x1
jax: 0.10.0
libtpu: 0.0.40
codegen_flags: <defaults>
</compile_context>

<pallas_src>
import math

import jax
import jax.numpy as jnp
from jax.experimental import pallas as pl
from jax.experimental.pallas import tpu as pltpu

_LANE = 128                 # output lane width (fused H padded to a multiple of this)
_TILE_M = 1024              # max row tile for the gridded path (multiple of 8)
_SINGLE_BLOCK_MAX_M = 1024  # up to this many rows: one gridless full-block call


def _decay_kernel(d_ref, wt_ref, b_ref, out_ref):
    # d_ref:  (tm, In)  VMEM
    # wt_ref: (In, Hp)  VMEM  (pre-transposed, lane-padded weight)
    # b_ref:  (1, Hp)   VMEM
    # out:    (tm, Hp)
    x = jnp.dot(d_ref[...], wt_ref[...], preferred_element_type=jnp.float32)  # MXU
    x = x + b_ref[...]                                                        # VPU
    out_ref[...] = jnp.exp(-jnp.maximum(x, 0.0)).astype(out_ref.dtype)        # EUP exp


def prepare_temporal_decay_params(Ws, bs):
    """One-time parameter prep (amortized across every forward call).

    Ws: sequence of (H_i, In) float32 weights, bs: sequence of (H_i,) biases.
    Heads are fused along the output dim, pre-transposed to (In, H_total) and
    zero-padded to Hp = multiple of 128 lanes. Padded columns produce
    exp(-relu(0)) = 1 and are sliced off after the call.
    """
    Ws = [jnp.asarray(W, jnp.float32) for W in Ws]
    bs = [jnp.asarray(b, jnp.float32) for b in bs]
    In = Ws[0].shape[1]
    for W, b in zip(Ws, bs):
        assert W.shape[1] == In and b.shape == (W.shape[0],)
    sizes = tuple(int(W.shape[0]) for W in Ws)
    H_total = sum(sizes)
    Hp = max(_LANE, ((H_total + _LANE - 1) // _LANE) * _LANE)

    wt = jnp.concatenate([W.T for W in Ws], axis=1)            # (In, H_total)
    bb = jnp.concatenate(bs, axis=0).reshape(1, H_total)        # (1, H_total)
    wt_pad = jnp.zeros((In, Hp), jnp.float32).at[:, :H_total].set(wt)
    b_pad = jnp.zeros((1, Hp), jnp.float32).at[:, :H_total].set(bb)
    return wt_pad, b_pad, sizes, H_total


def _choose_tile_m(M):
    """Pick a row tile for the gridded path: as large as possible (<= _TILE_M),
    with an even tile count so both v7x TensorCores get balanced work, rounded
    up to a sublane multiple of 8."""
    num_tiles = max(2, -(-M // _TILE_M))
    if num_tiles % 2:
        num_tiles += 1
    tile_m = -(-M // num_tiles)
    tile_m = ((tile_m + 7) // 8) * 8          # sublane multiple; never exceeds _TILE_M
    return tile_m


def temporal_decay_fused(params, d, *, out_dtype=jnp.float32, return_fused=False):
    """Apply the fused TemporalDecay heads to d of shape (..., In).

    All leading dims (e.g. (T, B)) are flattened into one matmul M dimension so a whole
    sequence is handled by a single kernel launch. Returns one gamma array per head with
    the leading dims restored, or the fused (..., H_total) slab if return_fused=True.
    out_dtype=jnp.bfloat16 halves the dominant HBM write stream (accuracy: ~3 sig digits).
    """
    wt_pad, b_pad, sizes, H_total = params
    In, Hp = wt_pad.shape
    assert d.shape[-1] == In, f"expected last dim {In}, got {d.shape}"
    lead = d.shape[:-1]
    M = math.prod(lead) if lead else 1
    d2 = d.reshape(M, In).astype(jnp.float32)

    if M <= _SINGLE_BLOCK_MAX_M:
        # Gridless call: full-array VMEM blocks, no grid-loop bookkeeping.
        out = pl.pallas_call(
            _decay_kernel,
            out_shape=jax.ShapeDtypeStruct((M, Hp), out_dtype),
        )(d2, wt_pad, b_pad)
    else:
        # Tile rows; weight/bias stay resident across the grid. No row padding and no
        # post-slice: Pallas clips the ragged final block's stores to (M, Hp).
        tile_m = _choose_tile_m(M)
        grid_m = pl.cdiv(M, tile_m)
        out = pl.pallas_call(
            _decay_kernel,
            out_shape=jax.ShapeDtypeStruct((M, Hp), out_dtype),
            grid=(grid_m,),
            in_specs=[
                pl.BlockSpec((tile_m, In), lambda i: (i, 0)),
                pl.BlockSpec((In, Hp), lambda i: (0, 0)),
                pl.BlockSpec((1, Hp), lambda i: (0, 0)),
            ],
            out_specs=pl.BlockSpec((tile_m, Hp), lambda i: (i, 0)),
            compiler_params=pltpu.CompilerParams(
                dimension_semantics=("parallel",)),  # megacore-shard rows on v7x
        )(d2, wt_pad, b_pad)

    if return_fused:
        return out[:, :H_total].reshape(lead + (H_total,))

    # Split fused heads and restore leading dims (fuses with the consumer under jit).
    gammas = []
    off = 0
    for h in sizes:
        gammas.append(out[:, off:off + h].reshape(lead + (h,)))
        off += h
    return tuple(gammas)


def temporal_decay(d, W, b, *, out_dtype=jnp.float32):
    """Single-module convenience wrapper matching the PyTorch forward exactly."""
    params = prepare_temporal_decay_params([W], [b])
    (gamma,) = temporal_decay_fused(params, d, out_dtype=out_dtype)
    return gamma


if __name__ == "__main__":
    # Small shapes consistent with the module's forward.
    batch, input_size, rnn_hid_size = 8, 16, 32

    key = jax.random.PRNGKey(0)
    k_d, k_w1, k_b1, k_w2, k_b2, k_ds, k_big, k_rag = jax.random.split(key, 8)

    # Deterministic init mirroring reset_parameters(): uniform(-stdv, stdv).
    stdv_h = 1.0 / math.sqrt(rnn_hid_size)
    W_h = jax.random.uniform(k_w1, (rnn_hid_size, input_size),
                             minval=-stdv_h, maxval=stdv_h, dtype=jnp.float32)
    b_h = jax.random.uniform(k_b1, (rnn_hid_size,),
                             minval=-stdv_h, maxval=stdv_h, dtype=jnp.float32)
    stdv_x = 1.0 / math.sqrt(input_size)
    W_x = jax.random.uniform(k_w2, (input_size, input_size),
                             minval=-stdv_x, maxval=stdv_x, dtype=jnp.float32)
    b_x = jax.random.uniform(k_b2, (input_size,),
                             minval=-stdv_x, maxval=stdv_x, dtype=jnp.float32)

    d = jnp.abs(jax.random.normal(k_d, (batch, input_size), dtype=jnp.float32))

    def ref(d_, W_, b_):
        return jnp.exp(-jnp.maximum(d_ @ W_.T + b_, 0.0))

    # 1) Single-module path (matches the PyTorch TemporalDecay.forward).
    gamma = jax.block_until_ready(temporal_decay(d, W_h, b_h))
    assert gamma.shape == (batch, rnn_hid_size)
    assert jnp.allclose(gamma, ref(d, W_h, b_h), atol=1e-5, rtol=1e-5)

    # 2) Fused BRITS usage: gamma_h + gamma_x for all T timesteps in ONE call (gridless).
    T = 8
    d_seq = jnp.abs(jax.random.normal(k_ds, (T, batch, input_size), dtype=jnp.float32))
    params = prepare_temporal_decay_params([W_h, W_x], [b_h, b_x])
    gamma_h, gamma_x = temporal_decay_fused(params, d_seq)
    gamma_h = jax.block_until_ready(gamma_h)
    gamma_x = jax.block_until_ready(gamma_x)
    assert gamma_h.shape == (T, batch, rnn_hid_size)
    assert gamma_x.shape == (T, batch, input_size)
    d_flat = d_seq.reshape(-1, input_size)
    assert jnp.allclose(gamma_h, ref(d_flat, W_h, b_h).reshape(T, batch, rnn_hid_size),
                        atol=1e-5, rtol=1e-5)
    assert jnp.allclose(gamma_x, ref(d_flat, W_x, b_x).reshape(T, batch, input_size),
                        atol=1e-5, rtol=1e-5)

    # 3) Larger stacked batch exercises the tiled ("parallel" grid) path with an even,
    #    balanced tile count (1280 rows -> 2 x 640-row tiles).
    T_big = 160
    d_big = jnp.abs(jax.random.normal(k_big, (T_big, batch, input_size), dtype=jnp.float32))
    gh_big, gx_big = temporal_decay_fused(params, d_big)
    gh_big = jax.block_until_ready(gh_big)
    gx_big = jax.block_until_ready(gx_big)
    d_big_flat = d_big.reshape(-1, input_size)
    assert jnp.allclose(gh_big, ref(d_big_flat, W_h, b_h).reshape(T_big, batch, rnn_hid_size),
                        atol=1e-5, rtol=1e-5)
    assert jnp.allclose(gx_big, ref(d_big_flat, W_x, b_x).reshape(T_big, batch, input_size),
                        atol=1e-5, rtol=1e-5)

    # 4) Ragged grid path: M not a multiple of 8 or of the tile size -> the final block's
    #    stores are clipped by Pallas to the real output shape (no wrapper pad/slice).
    M_rag = 1283
    d_rag = jnp.abs(jax.random.normal(k_rag, (M_rag, input_size), dtype=jnp.float32))
    gh_rag, gx_rag = temporal_decay_fused(params, d_rag)
    gh_rag = jax.block_until_ready(gh_rag)
    assert gh_rag.shape == (M_rag, rnn_hid_size)
    assert jnp.allclose(gh_rag, ref(d_rag, W_h, b_h), atol=1e-5, rtol=1e-5)
    assert jnp.allclose(gx_rag, ref(d_rag, W_x, b_x), atol=1e-5, rtol=1e-5)

    # 5) Optional bf16 writeback (accuracy trade-off: ~3 significant digits).
    gamma_bf16 = jax.block_until_ready(temporal_decay(d, W_h, b_h, out_dtype=jnp.bfloat16))
    assert gamma_bf16.dtype == jnp.bfloat16
    assert jnp.allclose(gamma_bf16.astype(jnp.float32), ref(d, W_h, b_h),
                        atol=1e-2, rtol=1e-2)

    print("KERNEL_OK")
</pallas_src>

<mosaic_0001>
module attributes {stable_mosaic.version = 11 : i64} {
  func.func @_decay_kernel(%arg0: memref<8x16xf32, #tpu.memory_space<vmem>>, %arg1: memref<16x128xf32, #tpu.memory_space<vmem>>, %arg2: memref<1x128xf32, #tpu.memory_space<vmem>>, %arg3: memref<8x128xf32, #tpu.memory_space<vmem>>) attributes {dimension_semantics = [], scalar_prefetch = 0 : i64, scratch_operands = 0 : i64, tpu.core_type = #tpu.core_type<tc>} {
    %c0 = arith.constant 0 : index
    %c0_0 = arith.constant 0 : index
    %0 = vector.load %arg0[%c0, %c0_0] : memref<8x16xf32, #tpu.memory_space<vmem>>, vector<8x16xf32>
    %c0_1 = arith.constant 0 : index
    %c0_2 = arith.constant 0 : index
    %1 = vector.load %arg1[%c0_1, %c0_2] : memref<16x128xf32, #tpu.memory_space<vmem>>, vector<16x128xf32>
    %cst = arith.constant dense<0.000000e+00> : vector<8x128xf32>
    %2 = tpu.matmul %0, %1, %cst {dimension_numbers = #tpu.dot_dimension_numbers<[1], [0], [0], [1], [0, 0, 1, 1], [], []>} : vector<8x16xf32>, vector<16x128xf32>, vector<8x128xf32> -> vector<8x128xf32>
    %c0_3 = arith.constant 0 : index
    %c0_4 = arith.constant 0 : index
    %3 = vector.load %arg2[%c0_3, %c0_4] : memref<1x128xf32, #tpu.memory_space<vmem>>, vector<1x128xf32>
    %4 = vector.broadcast %3 : vector<1x128xf32> to vector<8x128xf32>
    %5 = arith.addf %2, %4 : vector<8x128xf32>
    %cst_5 = arith.constant 0.000000e+00 : f32
    %6 = vector.broadcast %cst_5 : f32 to vector<8x128xf32>
    %7 = arith.maximumf %5, %6 : vector<8x128xf32>
    %cst_6 = arith.constant 0.000000e+00 : f32
    %8 = vector.broadcast %cst_6 : f32 to vector<8x128xf32>
    %9 = arith.subf %8, %7 : vector<8x128xf32>
    %10 = math.exp %9 : vector<8x128xf32>
    %c0_7 = arith.constant 0 : index
    %c0_8 = arith.constant 0 : index
    %11 = vector.load %arg3[%c0_7, %c0_8] : memref<8x128xf32, #tpu.memory_space<vmem>>, vector<8x128xf32>
    tpu.vector_store %arg3[%c0_7, %c0_8], %10 {strides = array<i32>} : memref<8x128xf32, #tpu.memory_space<vmem>>, vector<8x128xf32>,
    return
  }
}

</mosaic_0001>

<bundles_post_ra>
// kernel: tpu_custom_call.1
= control target key start
LH: loop header
LB: loop body
LE: loop exit
PB: predicated region body
PF: predicated region fallthrough
CT: control target
= control target key end

     0   :  { %8 = vsyncpa [#allocation3], 0  ;;  %s317_s0 = inlined_call_operand.hbm [shape: f32[8,16], index: 0, kind: input, shape index: {}]   ;;  %s318_s1 = inlined_call_operand.hbm [shape: f32[16,128], index: 1, kind: input, shape index: {}]   ;;  %s319_s2 = inlined_call_operand.vmem [shape: f32[1,128], index: 2, kind: input, shape index: {}]   ;;  %s320_s3 = inlined_call_operand.hbm [shape: f32[8,128], index: 3, kind: output, shape index: {}]  }
   0x1   :  { %9 = vsyncpa [#allocation6], 0 }
   0x2   :  { %10 = vsyncpa [#allocation4], 0  ;;  %s243_s12 = smov [#allocation2]   ;;  %s244_s14 = smov [#allocation5]  }
   0x3   :  { %s17_s13 = sshll.u32 %s243_s12, 4  ;;  %s26_s15 = sshll.u32 %s244_s14, 4  ;;  %s18_s13 = int_to_ptr.vmem [resolvable:$true] %s17_s13  ;;  %s271_s15 = int_to_ptr.vmem [resolvable:$true] %s26_s15 }
   0x4   :  { %s171_s18 = scalar_lea.hbm %s317_s0, 128 }
   0x5   :  { %p172_p0 = scmp.ne.s32.totalorder %s317_s0, %s171_s18  ;;  %p175_p1 = scmp.lt.u32.totalorder %s171_s18, %s317_s0 }
   0x7   :  { %p177_p2 = pnand %p175_p1, %p172_p0 }
   0x9   :  { %180 = shalt.err (!%p177_p2)
}
   0xa   :  { %s181_s23 = scalar_lea.vmem %s18_s13, 128  ;;  %p186_p4 = scmp.lt.s32.totalorder %s18_s13, %s18_s13 }
   0xb   :  { %p182_p3 = scmp.ne.s32.totalorder %s18_s13, %s181_s23  ;;  %p187_p5 = scmp.lt.s32.totalorder %s181_s23, %s181_s23 }
   0xd   :  { %p188_p6 = por %p187_p5, %p186_p4 }
   0xf   :  { %p189_p7 = pnand %p188_p6, %p182_p3 }
  0x11   :  { %192 = shalt.err (!%p189_p7)
}
  0x12   :  { %20 = dma.hbm_to_vmem [thread:$0]  %s317_s0, 128, %s18_s13, [#allocation3]  }
  0x13   :  { %s193_s28 = scalar_lea.hbm %s318_s1, 256 }
  0x14   :  { %p194_p8 = scmp.ne.s32.totalorder %s318_s1, %s193_s28  ;;  %p197_p9 = scmp.lt.u32.totalorder %s193_s28, %s318_s1 }
  0x16   :  { %p199_p10 = pnand %p197_p9, %p194_p8 }
  0x18   :  { %202 = shalt.err (!%p199_p10)
}
  0x19   :  { %s203_s6 = scalar_lea.vmem %s271_s15, 256  ;;  %p208_p12 = scmp.lt.s32.totalorder %s271_s15, %s271_s15 }
  0x1a   :  { %p204_p11 = scmp.ne.s32.totalorder %s271_s15, %s203_s6  ;;  %p209_p13 = scmp.lt.s32.totalorder %s203_s6, %s203_s6 }
  0x1c   :  { %p210_p0 = por %p209_p13, %p208_p12 }
  0x1e   :  { %p211_p1 = pnand %p210_p0, %p204_p11 }
  0x20   :  { %214 = shalt.err (!%p211_p1)
}
  0x21   :  { %s245_s0 = smov 128   ;;  %s246_s7 = smov 8  }
  0x22   :  { %32 = dma.hbm_to_vmem [thread:$0]  %s318_s1, 256, %s271_s15, [#allocation6], %s245_s0, %s245_s0, %s246_s7  }
  0x23   :  { %237 = dma.done.wait [#allocation3], 128  }
  0x24   :  { %238 = vsyncadd [#allocation3], 4294967168 }
  0x25   :  { %239 = dma.done.wait [#allocation6], 256  }
  0x26   :  { %240 = vsyncadd [#allocation6], 4294967040  ;;  %v247_v0 = vmov 0.0|0.0   ;;  %vm248_vm0 = vmmov 0   ;;  %v249_v1 = vmov 0.0   ;;  %v42_v2 = vld [vmem:[#allocation5] sm:$0xff] }
  0x27   :  { %158 = vmatprep.subr.bf16.mxu0 %v247_v0  ;;  %155 = vmatprep.mubr.msk.f32.mxu0 %vm248_vm0, %v249_v1  ;;  %v43_v3 = vld [vmem:[#allocation5 + $0x8] sm:$0xff]  ;;  %v41_v5 = vld [vmem:[#allocation2] sm:$0xff]  ;;  %vm51_vm1 = vcmask 130048   ;;  %s250_s1 = smov [#allocation7]  }
  0x28   :  { %v159_v4 = vpack.c.bf16 %v43_v3, %v42_v2  ;;  %v146_v6 = vld [vmem:[%s319_s2] ss:$0 sm:$0xff]  ;;  %s136_s12 = sshll.u32 %s250_s1, 4  ;;  %s137_s12 = int_to_ptr.vmem [resolvable:$true] %s136_s12 }
  0x29   :  { %s215_s13 = scalar_lea.vmem %s137_s12, 128  ;;  %p220_p3 = scmp.lt.s32.totalorder %s137_s12, %s137_s12 }
  0x2a   :  { %160 = vmatpush3.bf16.msra.mxu0 %v159_v4  ;;  %p216_p2 = scmp.ne.s32.totalorder %s137_s12, %s215_s13  ;;  %p221_p4 = scmp.lt.s32.totalorder %s215_s13, %s215_s13 }
  0x2c   :  { %p222_p5 = por %p221_p4, %p220_p3 }
  0x2d   :  { %156 = vmatmul.mubr.msk.f32.vlgmr.msra.gmra.mrb[0].mxu0 %vm51_vm1, %v41_v5 }
  0x2e   :  { %p223_p6 = pnand %p222_p5, %p216_p2 }
 0x100   :  { %v121_v7 = vpop.f32.mrb[0].mxu0 }
 0x101   :  { %v122_v8 = vadd.f32 %v146_v6, %v121_v7  ;;  %v157_v9 = vpop.f32.mrb[1].mxu0 }
 0x103   :  { %v125_v10 = vmax.f32 %v122_v8, 0.0 }
 0x105   :  { %v126_v11 = vsub.f32 0.0, %v125_v10 }
 0x107   :  { %v127_v12 = vmul.f32 1.442695, %v126_v11 }
 0x109   :  { %169 = vpow2.f32 %v127_v12 }
 0x113   :  { %v170_v13 = vpop.eup %169 }
 0x114   :  { %129 = vst [vmem:[#allocation7] sm:$0xff] %v170_v13 }
 0x115   :  { %226 = shalt.err (!%p223_p6)
}
 0x116   :  { %s227_s15 = scalar_lea.hbm %s320_s3, 128 }
 0x117   :  { %p228_p7 = scmp.ne.s32.totalorder %s320_s3, %s227_s15  ;;  %p231_p8 = scmp.lt.u32.totalorder %s227_s15, %s320_s3 }
 0x119   :  { %p233_p9 = pnand %p231_p8, %p228_p7 }
 0x11b   :  { %236 = shalt.err (!%p233_p9)
}
 0x11c   :  { %139 = dma.vmem_to_hbm [thread:$0]  %s137_s12, 128, %s320_s3, [#allocation4]  }
 0x11d   :  { %241 = dma.done.wait [#allocation4], 128  }
 0x11e   :  { %242 = vsyncadd [#allocation4], 4294967168 }
 0x11f   :  { %143 = vsyncpa [#allocation3], 1 }
 0x120   :  { %144 = vsyncpa [#allocation6], 1 }
 0x121   :  { %145 = vsyncpa [#allocation4], 1 }

</bundles_post_ra>
